<compile_context>
chip_gen: v7x
topology: tpu7x:2x2x1
jax: 0.10.0
libtpu: 0.0.40
codegen_flags: <defaults>
</compile_context>

<pallas_src>
import jax
import jax.numpy as jnp
from jax.experimental import pallas as pl
from jax.experimental.pallas import tpu as pltpu


def _round_up(n, m):
    return ((n + m - 1) // m) * m


def _cdiv(a, b):
    return -(-a // b)


def finetuner_kernel(x_ref, w1_ref, b1_ref, wmu_ref, bmu_ref, wp_ref, bp_ref, o_ref):
    w_dtype = w1_ref.dtype

    # In-kernel cast of the streaming input (x stays unpadded f32 in HBM).
    x = x_ref[...].astype(w_dtype)

    # Encoder hidden layer: Linear + ReLU.  MXU matmul, f32 accumulation;
    # bias-add / ReLU stay on the f32 accumulator.
    h = jnp.dot(x, w1_ref[...], preferred_element_type=jnp.float32)
    h = jnp.maximum(h + b1_ref[...], 0.0)

    # Embedding (mu) head: Linear.  Cast activation back to the weight dtype so
    # the MXU keeps its fast path; accumulate in f32.
    z = jnp.dot(h.astype(w_dtype), wmu_ref[...], preferred_element_type=jnp.float32)
    z = z + bmu_ref[...]

    # Predictor: Linear(embed_dim, n_output) -> narrow (n_output-wide) output.
    y = jnp.dot(z.astype(w_dtype), wp_ref[...], preferred_element_type=jnp.float32)
    y = y + bp_ref[...]

    o_ref[...] = y.astype(o_ref.dtype)


def prepare_params(params, compute_dtype=jnp.bfloat16):
    """One-time parameter prep (hoisted out of the per-call path).

    Pads the hidden/embedding dims to multiples of 128 (exact: zero columns stay
    zero through the ReLU/matmul chain), casts weights to the compute dtype, and
    keeps biases in f32 (added to the f32 accumulator inside the kernel).
    The output dim (n_output) is left unpadded (narrow output writeback).
    """
    D, H = params["w1"].shape
    E = params["wmu"].shape[1]
    Hp = _round_up(H, 128)
    Ep = _round_up(E, 128)
    return {
        "w1": jnp.pad(params["w1"].astype(compute_dtype), ((0, 0), (0, Hp - H))),
        "b1": jnp.pad(params["b1"].astype(jnp.float32), ((0, 0), (0, Hp - H))),
        "wmu": jnp.pad(
            params["wmu"].astype(compute_dtype), ((0, Hp - H), (0, Ep - E))
        ),
        "bmu": jnp.pad(params["bmu"].astype(jnp.float32), ((0, 0), (0, Ep - E))),
        "wp": jnp.pad(params["wp"].astype(compute_dtype), ((0, Ep - E), (0, 0))),
        "bp": params["bp"].astype(jnp.float32),
    }


def finetuner_forward(x, prepped, *, batch_tile=2048):
    """FineTuner forward pass with a single Pallas kernel, tiled over batch.

    x:       (B, input_dim) float32 (streamed unpadded; cast in-kernel).
    prepped: output of prepare_params() (weights in the compute dtype).
    Returns: (B, n_output) in the compute dtype.
    """
    B, D = x.shape
    Hp = prepped["w1"].shape[1]
    Ep = prepped["wmu"].shape[1]
    O = prepped["wp"].shape[1]
    out_dtype = prepped["w1"].dtype
    assert prepped["w1"].shape[0] == D, "input_dim mismatch between x and params"

    # Batch tiling: large tiles amortize the ~0.35us per-step overhead, rounded
    # to a multiple of 8 (sublane), sized so the padded batch doesn't over-pad,
    # and split into >=2 steps when possible so v7x's two TCs both get work.
    B8 = _round_up(max(B, 1), 8)
    bt_req = max(8, _round_up(min(batch_tile, B8), 8))
    grid_n = _cdiv(B8, bt_req)
    if grid_n == 1 and B8 >= 16:
        grid_n = 2
    bt = _round_up(_cdiv(B8, grid_n), 8)
    Bp = grid_n * bt

    # Only pad the batch when needed (no wrapper-side copy in the common case).
    x_p = x if Bp == B else jnp.pad(x, ((0, Bp - B), (0, 0)))

    kernel = pl.pallas_call(
        finetuner_kernel,
        out_shape=jax.ShapeDtypeStruct((Bp, O), out_dtype),
        grid_spec=pltpu.PrefetchScalarGridSpec(
            num_scalar_prefetch=0,
            grid=(grid_n,),
            in_specs=[
                # batch tile of x (unpadded f32, full last dim)
                pl.BlockSpec((bt, D), lambda i: (i, 0)),
                # grid-invariant weight / bias blocks (full arrays, fetched once)
                pl.BlockSpec((D, Hp), lambda i: (0, 0)),
                pl.BlockSpec((1, Hp), lambda i: (0, 0)),
                pl.BlockSpec((Hp, Ep), lambda i: (0, 0)),
                pl.BlockSpec((1, Ep), lambda i: (0, 0)),
                pl.BlockSpec((Ep, O), lambda i: (0, 0)),
                pl.BlockSpec((1, O), lambda i: (0, 0)),
            ],
            # Narrow output: last dim = n_output (full array dim), compute dtype.
            out_specs=pl.BlockSpec((bt, O), lambda i: (i, 0)),
        ),
        compiler_params=pltpu.CompilerParams(
            dimension_semantics=("parallel",),
            vmem_limit_bytes=32 * 1024 * 1024,
        ),
    )
    y_p = kernel(
        x_p,
        prepped["w1"],
        prepped["b1"],
        prepped["wmu"],
        prepped["bmu"],
        prepped["wp"],
        prepped["bp"],
    )
    # Slice back to the logical (B, n_output) result.
    return y_p[:B]


def init_params(key, input_dim, hidden_dim, embed_dim, n_output):
    """Deterministic synthetic parameters (shapes follow the nn.Linear layers)."""
    k1, k2, k3, k4, k5, k6 = jax.random.split(key, 6)
    scale = 0.05
    return {
        # encoder Linear(input_dim, hidden_dim)  -> stored as (in, out)
        "w1": scale * jax.random.normal(k1, (input_dim, hidden_dim), jnp.float32),
        "b1": scale * jax.random.normal(k2, (1, hidden_dim), jnp.float32),
        # mu head Linear(hidden_dim, embed_dim)
        "wmu": scale * jax.random.normal(k3, (hidden_dim, embed_dim), jnp.float32),
        "bmu": scale * jax.random.normal(k4, (1, embed_dim), jnp.float32),
        # predictor Linear(embed_dim, n_output)
        "wp": scale * jax.random.normal(k5, (embed_dim, n_output), jnp.float32),
        "bp": scale * jax.random.normal(k6, (1, n_output), jnp.float32),
    }


def reference_forward(x, p):
    """Pure-JAX f32 reference of the same forward pass."""
    h = jnp.maximum(x @ p["w1"] + p["b1"], 0.0)
    z = h @ p["wmu"] + p["bmu"]
    return z @ p["wp"] + p["bp"]


if __name__ == "__main__":
    # Small shapes consistent with the module:
    #   batch=16, input_dim=32, hidden_dim=32, embed_dim=32, n_output=4
    B, D, H, E, O = 16, 32, 32, 32, 4

    key = jax.random.PRNGKey(0)
    kx, kp = jax.random.split(key)
    x = jax.random.normal(kx, (B, D), jnp.float32)
    params = init_params(kp, D, H, E, O)

    y_ref = reference_forward(x, params)

    fwd = jax.jit(finetuner_forward)

    # 1) f32 compute path: must match the pure-JAX reference tightly.
    prepped_f32 = prepare_params(params, compute_dtype=jnp.float32)
    y32 = jax.block_until_ready(fwd(x, prepped_f32))
    assert y32.shape == (B, O) and y32.dtype == jnp.float32
    assert jnp.allclose(y32, y_ref, atol=1e-5, rtol=1e-5), "f32 mismatch vs reference"

    # 2) Fast path: bf16 operands + bf16 output, f32 accumulation.
    prepped_bf16 = prepare_params(params, compute_dtype=jnp.bfloat16)
    y16 = jax.block_until_ready(fwd(x, prepped_bf16))
    assert y16.shape == (B, O)
    assert jnp.allclose(
        y16.astype(jnp.float32), y_ref, atol=3e-2, rtol=3e-2
    ), "bf16 mismatch vs reference"

    print("KERNEL_OK")
</pallas_src>

<mosaic_0001>
module attributes {stable_mosaic.version = 11 : i64} {
  func.func @finetuner_kernel(%arg0: i32, %arg1: memref<8x32xf32, #tpu.memory_space<vmem>>, %arg2: memref<32x128xf32, #tpu.memory_space<vmem>>, %arg3: memref<1x128xf32, #tpu.memory_space<vmem>>, %arg4: memref<128x128xf32, #tpu.memory_space<vmem>>, %arg5: memref<1x128xf32, #tpu.memory_space<vmem>>, %arg6: memref<128x4xf32, #tpu.memory_space<vmem>>, %arg7: memref<1x4xf32, #tpu.memory_space<vmem>>, %arg8: memref<8x4xf32, #tpu.memory_space<vmem>>) attributes {dimension_semantics = [#tpu.dimension_semantics<parallel>], iteration_bounds = array<i64: 2>, scalar_prefetch = 0 : i64, scratch_operands = 0 : i64, tpu.core_type = #tpu.core_type<tc>, window_params = [{transform_indices = @transform_0, window_bounds = array<i64: 8, 32>}, {pipeline_mode = #tpu.pipeline_mode<synchronous>, transform_indices = @transform_1, window_bounds = array<i64: 32, 128>}, {pipeline_mode = #tpu.pipeline_mode<synchronous>, transform_indices = @transform_2, window_bounds = array<i64: 1, 128>}, {pipeline_mode = #tpu.pipeline_mode<synchronous>, transform_indices = @transform_3, window_bounds = array<i64: 128, 128>}, {pipeline_mode = #tpu.pipeline_mode<synchronous>, transform_indices = @transform_4, window_bounds = array<i64: 1, 128>}, {pipeline_mode = #tpu.pipeline_mode<synchronous>, transform_indices = @transform_5, window_bounds = array<i64: 128, 4>}, {pipeline_mode = #tpu.pipeline_mode<synchronous>, transform_indices = @transform_6, window_bounds = array<i64: 1, 4>}, {transform_indices = @transform_7, window_bounds = array<i64: 8, 4>}]} {
    %c0 = arith.constant 0 : index
    %c0_0 = arith.constant 0 : index
    %0 = vector.load %arg1[%c0, %c0_0] : memref<8x32xf32, #tpu.memory_space<vmem>>, vector<8x32xf32>
    %c0_1 = arith.constant 0 : index
    %c0_2 = arith.constant 0 : index
    %1 = vector.load %arg2[%c0_1, %c0_2] : memref<32x128xf32, #tpu.memory_space<vmem>>, vector<32x128xf32>
    %cst = arith.constant dense<0.000000e+00> : vector<8x128xf32>
    %2 = tpu.matmul %0, %1, %cst {dimension_numbers = #tpu.dot_dimension_numbers<[1], [0], [0], [1], [0, 0, 1, 1], [], []>} : vector<8x32xf32>, vector<32x128xf32>, vector<8x128xf32> -> vector<8x128xf32>
    %c0_3 = arith.constant 0 : index
    %c0_4 = arith.constant 0 : index
    %3 = vector.load %arg3[%c0_3, %c0_4] : memref<1x128xf32, #tpu.memory_space<vmem>>, vector<1x128xf32>
    %4 = vector.broadcast %3 : vector<1x128xf32> to vector<8x128xf32>
    %5 = arith.addf %2, %4 : vector<8x128xf32>
    %cst_5 = arith.constant 0.000000e+00 : f32
    %6 = vector.broadcast %cst_5 : f32 to vector<8x128xf32>
    %7 = arith.maximumf %5, %6 : vector<8x128xf32>
    %c0_6 = arith.constant 0 : index
    %c0_7 = arith.constant 0 : index
    %8 = vector.load %arg4[%c0_6, %c0_7] : memref<128x128xf32, #tpu.memory_space<vmem>>, vector<128x128xf32>
    %cst_8 = arith.constant dense<0.000000e+00> : vector<8x128xf32>
    %9 = tpu.matmul %7, %8, %cst_8 {dimension_numbers = #tpu.dot_dimension_numbers<[1], [0], [0], [1], [0, 0, 1, 1], [], []>} : vector<8x128xf32>, vector<128x128xf32>, vector<8x128xf32> -> vector<8x128xf32>
    %c0_9 = arith.constant 0 : index
    %c0_10 = arith.constant 0 : index
    %10 = vector.load %arg5[%c0_9, %c0_10] : memref<1x128xf32, #tpu.memory_space<vmem>>, vector<1x128xf32>
    %11 = vector.broadcast %10 : vector<1x128xf32> to vector<8x128xf32>
    %12 = arith.addf %9, %11 : vector<8x128xf32>
    %c0_11 = arith.constant 0 : index
    %c0_12 = arith.constant 0 : index
    %13 = vector.load %arg6[%c0_11, %c0_12] : memref<128x4xf32, #tpu.memory_space<vmem>>, vector<128x4xf32>
    %cst_13 = arith.constant dense<0.000000e+00> : vector<8x4xf32>
    %14 = tpu.matmul %12, %13, %cst_13 {dimension_numbers = #tpu.dot_dimension_numbers<[1], [0], [0], [1], [0, 0, 1, 1], [], []>} : vector<8x128xf32>, vector<128x4xf32>, vector<8x4xf32> -> vector<8x4xf32>
    %c0_14 = arith.constant 0 : index
    %c0_15 = arith.constant 0 : index
    %15 = vector.load %arg7[%c0_14, %c0_15] : memref<1x4xf32, #tpu.memory_space<vmem>>, vector<1x4xf32>
    %16 = vector.broadcast %15 : vector<1x4xf32> to vector<8x4xf32>
    %17 = arith.addf %14, %16 : vector<8x4xf32>
    %c0_16 = arith.constant 0 : index
    %c0_17 = arith.constant 0 : index
    %18 = vector.load %arg8[%c0_16, %c0_17] : memref<8x4xf32, #tpu.memory_space<vmem>>, vector<8x4xf32>
    tpu.vector_store %arg8[%c0_16, %c0_17], %17 {strides = array<i32>} : memref<8x4xf32, #tpu.memory_space<vmem>>, vector<8x4xf32>,
    return
  }
  func.func @transform_0(%arg0: i32) -> (i32, i32) {
    %c0_i32 = arith.constant 0 : i32
    %c0_i32_0 = arith.constant 0 : i32
    return %arg0, %c0_i32 : i32, i32
  }
  func.func @transform_1(%arg0: i32) -> (i32, i32) {
    %c0_i32 = arith.constant 0 : i32
    %c0_i32_0 = arith.constant 0 : i32
    %c0_i32_1 = arith.constant 0 : i32
    return %c0_i32, %c0_i32_0 : i32, i32
  }
  func.func @transform_2(%arg0: i32) -> (i32, i32) {
    %c0_i32 = arith.constant 0 : i32
    %c0_i32_0 = arith.constant 0 : i32
    %c0_i32_1 = arith.constant 0 : i32
    return %c0_i32, %c0_i32_0 : i32, i32
  }
  func.func @transform_3(%arg0: i32) -> (i32, i32) {
    %c0_i32 = arith.constant 0 : i32
    %c0_i32_0 = arith.constant 0 : i32
    %c0_i32_1 = arith.constant 0 : i32
    return %c0_i32, %c0_i32_0 : i32, i32
  }
  func.func @transform_4(%arg0: i32) -> (i32, i32) {
    %c0_i32 = arith.constant 0 : i32
    %c0_i32_0 = arith.constant 0 : i32
    %c0_i32_1 = arith.constant 0 : i32
    return %c0_i32, %c0_i32_0 : i32, i32
  }
  func.func @transform_5(%arg0: i32) -> (i32, i32) {
    %c0_i32 = arith.constant 0 : i32
    %c0_i32_0 = arith.constant 0 : i32
    %c0_i32_1 = arith.constant 0 : i32
    return %c0_i32, %c0_i32_0 : i32, i32
  }
  func.func @transform_6(%arg0: i32) -> (i32, i32) {
    %c0_i32 = arith.constant 0 : i32
    %c0_i32_0 = arith.constant 0 : i32
    %c0_i32_1 = arith.constant 0 : i32
    return %c0_i32, %c0_i32_0 : i32, i32
  }
  func.func @transform_7(%arg0: i32) -> (i32, i32) {
    %c0_i32 = arith.constant 0 : i32
    %c0_i32_0 = arith.constant 0 : i32
    return %arg0, %c0_i32 : i32, i32
  }
}

</mosaic_0001>

<bundles_post_ra>
// kernel: finetuner_forward.1
= control target key start
LH: loop header
LB: loop body
LE: loop exit
PB: predicated region body
PF: predicated region fallthrough
CT: control target
= control target key end

     0   :  { %12 = vsyncpa [#allocation3], 0  ;;  %s928_s24 = smov 0   ;;  %s1117_s0 = inlined_call_operand.vmem [shape: f32[16,32], index: 0, kind: input, shape index: {}]   ;;  %s1118_s1 = inlined_call_operand.hbm [shape: f32[32,128], index: 1, kind: input, shape index: {}]   ;;  %s1119_s2 = inlined_call_operand.vmem [shape: f32[1,128], index: 2, kind: input, shape index: {}]   ;;  %s1120_s3 = inlined_call_operand.vmem [shape: f32[128,128], index: 3, kind: input, shape index: {}]   ;;  %s1121_s4 = inlined_call_operand.vmem [shape: f32[1,128], index: 4, kind: input, shape index: {}]   ;;  %s1122_s5 = inlined_call_operand.vmem [shape: f32[128,4], index: 5, kind: input, shape index: {}]   ;;  %s1123_s6 = inlined_call_operand.vmem [shape: f32[1,4], index: 6, kind: input, shape index: {}]   ;;  %s1124_s7 = inlined_call_operand.vmem [shape: f32[16,4], index: 7, kind: output, shape index: {}]  }
   0x1 LB: > { %s934_s25 = sadd.s32 4294967295, %s880_s24   ;;  %p631_p0 = scmp.ge.s32.totalorder %s880_s24, 1  ;;  %s880_s24 = sphi %s928_s24, %s18_s24  }
   0x2   : > { %p201_p1 = scmp.lt.s32.totalorder %s880_s24, 3  ;;  %s882_s26 = smov [#allocation2]  }
   0x3   : > { %s213_s27 = sshll.u32 %s882_s26, 4  ;;  %p1125_p3 = scmp.eq.s32.totalorder %s934_s25, 0  ;;  %s214_s27 = int_to_ptr.vmem [resolvable:$true] %s213_s27 }
   0x4   : > { %p938_p2 = pnand %p631_p0, %p201_p1  ;;  %s842_s9 = scalar_lea.hbm %s1118_s1, 512 }
   0x5   : > { %p843_p6 = scmp.ne.s32.totalorder %s1118_s1, %s842_s9  ;;  %p849_p10 = scmp.lt.u32.totalorder %s842_s9, %s1118_s1 }
   0x6   : > { %s1127_s28 = scalar_select %p938_p2, 1, 0 }
   0x7   : > { %p822_p4 = pneg %p938_p2 }
   0x9   : > { %p947_p5 = pnand %p1125_p3, %p822_p4 }
   0xb   : > { %p844_p7 = pneg %p947_p5 }
   0xd   : > { %p845_p8 = pnand %p844_p7, %p843_p6 }
   0xf   : > { %p846_p9 = pneg %p845_p8 }
  0x11   : > { %p851_p11 = pnand %p849_p10, %p846_p9 }
  0x13   : > { %854 = shalt.err (!%p851_p11)
}
  0x14   : > { %s855_s14 = scalar_lea.vmem %s214_s27, 512  ;;  %p863_p1 = scmp.lt.s32.totalorder %s214_s27, %s214_s27 }
  0x15   : > { %p856_p12 = scmp.ne.s32.totalorder %s214_s27, %s855_s14  ;;  %p864_p4 = scmp.lt.s32.totalorder %s855_s14, %s855_s14 }
  0x17   : > { %p858_p13 = pnand %p856_p12, %p844_p7  ;;  %p865_p3 = por %p864_p4, %p863_p1 }
  0x19   : > { %p859_p0 = pneg %p858_p13 }
  0x1b   : > { %p866_p2 = pnand %p865_p3, %p859_p0 }
  0x1d   : > { %869 = shalt.err (!%p866_p2)
}
  0x1e   : > { %s883_s15 = smov 128   ;;  %s884_s16 = smov 8  }
  0x1f   : > { %825 = dma.hbm_to_vmem [thread:$0]  (!%p947_p5), %s1118_s1, 512, %s214_s27, [#allocation3], %s883_s15, %s883_s15, %s884_s16  }
  0x20   : > { %p1129_p6 = scmp.ne.s32.totalorder %s1127_s28, 0 }
  0x21   : > { %p1130_p8 = scmp.eq.s32.totalorder (!%p1129_p6), %s934_s25, 0 }
  0x22   : > { %251 = sbr.rel (%p1129_p6) target bundleno = 697 (0x2b9), region = 48 }
  0x29   : > { %875 = dma.done.wait (%p1130_p8), [#allocation3], 512   ;;  %p1131_p7 = pmov %p1130_p8 }
  0x2a   : > { %p281_p2 = scmp.lt.s32.totalorder %s934_s25, 1  ;;  %v885_v0 = vmov 0.0|0.0   ;;  %vm886_vm0 = vmmov 0   ;;  %v887_v1 = vmov 0.0   ;;  %v290_v2 = vld [vmem:[#allocation2] sm:$0xff]  ;;  %v291_v3 = vld [vmem:[#allocation2 + $0x8] sm:$0xff] }
  0x2b   : > { %877 = vsyncadd (%p1131_p7), [#allocation3], 4294966784  ;;  %764 = vmatprep.subr.bf16.mxu0 %v885_v0  ;;  %691 = vmatprep.mubr.msk.f32.mxu0 %vm886_vm0, %v887_v1  ;;  %v292_v4 = vld [vmem:[#allocation2 + $0x10] sm:$0xff]  ;;  %v765_v5 = vpack.c.bf16 %v291_v3, %v290_v2  ;;  %v293_v6 = vld [vmem:[#allocation2 + $0x18] sm:$0xff]  ;;  %vm301_vm1 = vcmask 261120   ;;  %vm562_vm2 = vcmask 31744  }
  0x2c   : > { %770 = vmatprep.subr.bf16.mxu1 %v885_v0  ;;  %726 = vmatprep.mubr.msk.f32.mxu1 %vm886_vm0, %v887_v1  ;;  %s1133_s25 = smov (!%p281_p2, %s934_s25), 1  ;;  %v376_v7 = vld [vmem:[%s1120_s3] sm:$0xff]  ;;  %v377_v8 = vld [vmem:[%s1120_s3 + $0x8] sm:$0xff]  ;;  %v378_v9 = vld [vmem:[%s1120_s3 + $0x10] sm:$0xff]  ;;  %v768_v11 = vpack.c.bf16 %v293_v6, %v292_v4 }
  0x2d   : > { %s636_s19 = sshll.u32 %s1133_s25, 3  ;;  %v379_v10 = vld [vmem:[%s1120_s3 + $0x18] sm:$0xff]  ;;  %766 = vmatpush3.bf16.msra.mxu0 %v765_v5  ;;  %v771_v12 = vpack.c.bf16 %v377_v8, %v376_v7  ;;  %v380_v14 = vld [vmem:[%s1120_s3 + $0x20] sm:$0xff]  ;;  %v381_v15 = vld [vmem:[%s1120_s3 + $0x28] sm:$0xff] }
  0x2e   : > { %767 = vmatprep.subr.bf16.mxu0 %v885_v0  ;;  %s284_s9 = scalar_lea.vmem %s1117_s0, %s636_s19  ;;  %v774_v13 = vpack.c.bf16 %v379_v10, %v378_v9  ;;  %v777_v17 = vpack.c.bf16 %v381_v15, %v380_v14  ;;  %v382_v18 = vld [vmem:[%s1120_s3 + $0x30] sm:$0xff]  ;;  %v383_v19 = vld [vmem:[%s1120_s3 + $0x38] sm:$0xff]  ;;  %v384_v21 = vld [vmem:[%s1120_s3 + $0x40] sm:$0xff]  ;;  %s288_s14 = scalar_lea.vmem %s1124_s7, %s636_s19 }
  0x2f   : > { %772 = vmatpush3.bf16.msra.mxu1 %v771_v12  ;;  %v289_v16 = vld [vmem:[%s284_s9] sm:$0xff]  ;;  %v780_v20 = vpack.c.bf16 %v383_v19, %v382_v18  ;;  %v385_v22 = vld [vmem:[%s1120_s3 + $0x48] sm:$0xff]  ;;  %v386_v24 = vld [vmem:[%s1120_s3 + $0x50] sm:$0xff] }
  0x30   : > { %773 = vmatprep.subr.bf16.mxu1 %v885_v0  ;;  %v783_v23 = vpack.c.bf16 %v385_v22, %v384_v21  ;;  %v387_v25 = vld [vmem:[%s1120_s3 + $0x58] sm:$0xff]  ;;  %v388_v27 = vld [vmem:[%s1120_s3 + $0x60] sm:$0xff]  ;;  %v389_v28 = vld [vmem:[%s1120_s3 + $0x68] sm:$0xff] }
  0x31   : > { %769 = vmatpush3.bf16.msra.mxu0 %v768_v11  ;;  %v786_v26 = vpack.c.bf16 %v387_v25, %v386_v24  ;;  %v789_v29 = vpack.c.bf16 %v389_v28, %v388_v27  ;;  %v390_v30 = vld [vmem:[%s1120_s3 + $0x70] sm:$0xff]  ;;  %v391_v31 = vld [vmem:[%s1120_s3 + $0x78] sm:$0xff]  ;;  %v469_v33 = vld [vmem:[%s1122_s5] sm:$0xff] }
  0x32   : > { %794 = vmatprep.subr.bf16.mxu0 %v885_v0  ;;  %v792_v32 = vpack.c.bf16 %v391_v31, %v390_v30  ;;  %v470_v34 = vld [vmem:[%s1122_s5 + $0x8] sm:$0xff]  ;;  %v471_v35 = vld [vmem:[%s1122_s5 + $0x10] sm:$0xff]  ;;  %v472_v37 = vld [vmem:[%s1122_s5 + $0x18] sm:$0xff] }
  0x33   : > { %775 = vmatpush3.bf16.msra.mxu1 %v774_v13  ;;  %v795_v36 = vpack.c.bf16 %v470_v34, %v469_v33  ;;  %v798_v38 = vpack.c.bf16 %v472_v37, %v471_v35  ;;  %v473_v39 = vld [vmem:[%s1122_s5 + $0x20] sm:$0xff]  ;;  %v474_v40 = vld [vmem:[%s1122_s5 + $0x28] sm:$0xff]  ;;  %v475_v42 = vld [vmem:[%s1122_s5 + $0x30] sm:$0xff] }
  0x34   : > { %692 = vmatmul.mubr.msk.f32.vlgmr.msra.gmra.mrb[0].mxu0 %vm301_vm1, %v289_v16  ;;  %776 = vmatprep.subr.bf16.mxu1 %v885_v0  ;;  %v801_v41 = vpack.c.bf16 %v474_v40, %v473_v39  ;;  %v476_v43 = vld [vmem:[%s1122_s5 + $0x38] sm:$0xff]  ;;  %v477_v45 = vld [vmem:[%s1122_s5 + $0x40] sm:$0xff]  ;;  %v478_v46 = vld [vmem:[%s1122_s5 + $0x48] sm:$0xff] }
  0x35   : > { %761 = vmatprep.mubr.msk.f32.mxu0 %vm886_vm0, %v887_v1  ;;  %796 = vmatpush3.bf16.msra.mxu0 %v795_v36  ;;  %v804_v44 = vpack.c.bf16 %v476_v43, %v475_v42  ;;  %v807_v47 = vpack.c.bf16 %v478_v46, %v477_v45  ;;  %v479_v48 = vld [vmem:[%s1122_s5 + $0x50] sm:$0xff]  ;;  %v480_v49 = vld [vmem:[%s1122_s5 + $0x58] sm:$0xff]  ;;  %v481_v51 = vld [vmem:[%s1122_s5 + $0x60] sm:$0xff] }
  0x36   : > { %797 = vmatprep.subr.bf16.mxu0 %v885_v0  ;;  %v810_v50 = vpack.c.bf16 %v480_v49, %v479_v48  ;;  %v482_v52 = vld [vmem:[%s1122_s5 + $0x68] sm:$0xff]  ;;  %v638_v54 = vld [vmem:[%s1119_s2] ss:$0 sm:$0xff]  ;;  %v483_v59 = vld [vmem:[%s1122_s5 + $0x70] sm:$0xff] }
  0x37   : > { %778 = vmatpush3.bf16.msra.mxu1 %v777_v17  ;;  %v813_v53 = vpack.c.bf16 %v482_v52, %v481_v51  ;;  %v484_v60 = vld [vmem:[%s1122_s5 + $0x78] sm:$0xff]  ;;  %v640_v62 = vld [vmem:[%s1121_s4] ss:$0 sm:$0xff] }
  0x38   : > { %779 = vmatprep.subr.bf16.mxu1 %v885_v0  ;;  %v816_v61 = vpack.c.bf16 %v484_v60, %v483_v59  ;;  %v641_v2 = vld [vmem:[%s1123_s6] ss:$0 sm:$0xff] }
  0x39   : > { %799 = vmatpush3.bf16.msra.mxu0 %v798_v38 }
  0x3a   : > { %800 = vmatprep.subr.bf16.mxu0 %v885_v0 }
  0x3b   : > { %781 = vmatpush3.bf16.msra.mxu1 %v780_v20 }
  0x3c   : > { %782 = vmatprep.subr.bf16.mxu1 %v885_v0 }
  0x3d   : > { %802 = vmatpush3.bf16.msra.mxu0 %v801_v41 }
  0x3e   : > { %803 = vmatprep.subr.bf16.mxu0 %v885_v0 }
  0x3f   : > { %784 = vmatpush3.bf16.msra.mxu1 %v783_v23 }
  0x40   : > { %785 = vmatprep.subr.bf16.mxu1 %v885_v0 }
  0x41   : > { %805 = vmatpush3.bf16.msra.mxu0 %v804_v44 }
  0x42   : > { %806 = vmatprep.subr.bf16.mxu0 %v885_v0 }
  0x43   : > { %787 = vmatpush3.bf16.msra.mxu1 %v786_v26 }
  0x44   : > { %788 = vmatprep.subr.bf16.mxu1 %v885_v0 }
  0x45   : > { %808 = vmatpush3.bf16.msra.mxu0 %v807_v47 }
  0x46   : > { %809 = vmatprep.subr.bf16.mxu0 %v885_v0 }
  0x47   : > { %790 = vmatpush3.bf16.msra.mxu1 %v789_v29 }
  0x48   : > { %791 = vmatprep.subr.bf16.mxu1 %v885_v0 }
  0x49   : > { %811 = vmatpush3.bf16.msra.mxu0 %v810_v50 }
  0x4a   : > { %812 = vmatprep.subr.bf16.mxu0 %v885_v0 }
  0x4b   : > { %793 = vmatpush3.bf16.msra.mxu1 %v792_v32 }
  0x4d   : > { %814 = vmatpush3.bf16.msra.mxu0 %v813_v53 }
  0x4e   : > { %815 = vmatprep.subr.bf16.mxu0 %v885_v0 }
  0x51   : > { %817 = vmatpush3.bf16.msra.mxu0 %v816_v61 }
 0x107   : > { %v371_v55 = vpop.f32.mrb[0].mxu0 }
 0x108   : > { %v372_v56 = vadd.f32 %v638_v54, %v371_v55  ;;  %v693_v57 = vpop.f32.mrb[1].mxu0 }
 0x10a   : > { %v375_v58 = vmax.f32 %v372_v56, 0.0 }
 0x10c   : > { %727 = vmatmul.mubr.f32.vlgmr.msra.gmra.mrb[0].mxu1 %v375_v58 }
 0x1df   : > { %v465_v63 = vpop.f32.mrb[0].mxu1 }
 0x1e0   : > { %v466_v0 = vadd.f32 %v640_v62, %v465_v63  ;;  %v728_v1 = vpop.f32.mrb[1].mxu1 }
 0x1e2   : > { %762 = vmatmul.mubr.f32.vlgmr.msra.gmra.mrb[2].mxu0 %v466_v0 }
 0x2b5   : > { %v558_v3 = vpop.f32.mrb[2].mxu0 }
 0x2b6   : > { %v559_v4 = vadd.f32 %v641_v2, %v558_v3  ;;  %v763_v5 = vpop.f32.mrb[3].mxu0 }
 0x2b8   : > { %563 = vst.msk [vmem:[%s288_s14] sm:$0xff] %vm562_vm2, %v559_v4 }
 0x2b9 PF: > { %s18_s24 = sadd.s32 1, %s880_s24  }
 0x2ba   : > { %p15_p3 = scmp.ge.s32.totalorder %s18_s24, 4  }
 0x2bc   :  { %17 = sbr.rel (!%p15_p3) target bundleno = 1 (0x1), region = 83 }
 0x2c3   :  { %583 = vsyncpa [#allocation3], 1 }
 0x2c4   :  { %585 = vsyncpa [#allocation3 + $0x1], 1 }

</bundles_post_ra>
